<compile_context>
chip_gen: v5e
topology: v5e:2x2
jax: 0.10.0
libtpu: 0.0.40
codegen_flags: <defaults>
</compile_context>

<pallas_src>
import functools

import jax
import jax.numpy as jnp
from jax.experimental import pallas as pl
from jax.experimental.pallas import tpu as pltpu


def _cnn_kernel(x_ref, weff_ref, beff_ref, w23_ref, b23_ref, out_ref, *,
                pool, pool_len, n_filters):
    """Per-batch-tile pipeline (batch on the lane axis).

    Shapes (per grid step):
      x_ref:    (C*P, TB)        flattened input, batch on lanes
      weff_ref: (Lc*F, C*P)      folded fc1+conv weight, rows ordered t*F+f
      beff_ref: (Lc*F, 1)        folded fc1+conv bias
      w23_ref:  (O3, Lp*F)       folded fc2+fc3 weight, cols ordered u*F+f
      b23_ref:  (O3, 1)          folded fc2+fc3 bias
      out_ref:  (O3, TB)
    """
    tb = x_ref.shape[-1]

    # fc1 + conv1d ('valid') folded: s[(t,f), b] = sum_{c,p} W_eff[(t,f),(c,p)] * x[(c,p), b]
    s = jnp.dot(weff_ref[...], x_ref[...], preferred_element_type=jnp.float32)   # (Lc*F, TB)
    s = jnp.maximum(s + beff_ref[...], 0.0)                                       # ReLU

    # maxpool1d(pool) over time (rows are t*F+f, pool tail truncated like PyTorch):
    # view as (Lp, pool*F, TB) and take elementwise max over the `pool` positions
    # (each a sublane-aligned slice of width F).
    s3 = s[: pool_len * pool * n_filters, :].reshape(pool_len, pool * n_filters, tb)
    pooled = s3[:, 0:n_filters, :]
    for j in range(1, pool):
        pooled = jnp.maximum(pooled, s3[:, j * n_filters:(j + 1) * n_filters, :])
    pooled = pooled.reshape(pool_len * n_filters, tb)                              # (Lp*F, TB)

    # flatten + fc2 + fc3 folded into a single matmul; lane-dense writeback.
    out = jnp.dot(w23_ref[...], pooled, preferred_element_type=jnp.float32) + b23_ref[...]
    out_ref[...] = out.astype(out_ref.dtype)                                       # (O3, TB)


@functools.partial(jax.jit, static_argnames=("kernel_size", "pool_size", "batch_tile"))
def cnn_forward(x, params, *, kernel_size, pool_size, batch_tile=128):
    """x: (B, n_variables, previous_steps) float32 (NCW, like PyTorch)."""
    W1, b1, Wc, bc, W2, b2, W3, b3 = params
    B, C, P = x.shape
    H = W1.shape[0]
    F = Wc.shape[0]
    K = kernel_size
    Lc = H - K + 1
    Lp = Lc // pool_size
    assert Lp >= 1, "pooled length must be >= 1"
    O3 = W3.shape[0]

    # ---- fold fc1 + conv1d (exact; both linear, before the ReLU) -------------------
    # W_eff[t*F+f, c*P+p] = sum_k Wc[f,c,k] * W1[t+k,p]
    W1_win = jnp.stack([W1[k:k + Lc] for k in range(K)], axis=1)          # (Lc, K, P)
    W_eff = jnp.einsum('tkp,fck->tfcp', W1_win, Wc).reshape(Lc * F, C * P)
    b1_win = jnp.stack([b1[k:k + Lc] for k in range(K)], axis=1)          # (Lc, K)
    b_eff = (jnp.einsum('tk,fck->tf', b1_win, Wc) + bc[None, :]).reshape(Lc * F, 1)

    # ---- fold fc2 + fc3 (exact; no activation between them) ------------------------
    # PyTorch flatten order is f*Lp+u; kernel's pooled row order is u*F+f -> permute cols.
    W23 = W3 @ W2                                                          # (O3, F*Lp)
    W23p = W23.reshape(O3, F, Lp).transpose(0, 2, 1).reshape(O3, Lp * F)   # cols: u*F+f
    b23 = (W3 @ b2 + b3).reshape(O3, 1)

    # ---- lane-dense input: (C*P, B_pad), batch on the lane axis ---------------------
    TB = batch_tile
    n_steps = pl.cdiv(B, TB)
    B_pad = n_steps * TB
    x_flat = x.reshape(B, C * P).T                                         # (C*P, B)
    if B_pad != B:
        x_flat = jnp.pad(x_flat, ((0, 0), (0, B_pad - B)))

    kernel = functools.partial(_cnn_kernel, pool=pool_size, pool_len=Lp, n_filters=F)

    out = pl.pallas_call(
        kernel,
        out_shape=jax.ShapeDtypeStruct((O3, B_pad), jnp.float32),
        grid_spec=pltpu.PrefetchScalarGridSpec(
            num_scalar_prefetch=0,
            grid=(n_steps,),
            in_specs=[
                pl.BlockSpec((C * P, TB), lambda i: (0, i)),      # x tile (batch on lanes)
                pl.BlockSpec((Lc * F, C * P), lambda i: (0, 0)),  # folded fc1+conv weight
                pl.BlockSpec((Lc * F, 1), lambda i: (0, 0)),      # folded fc1+conv bias
                pl.BlockSpec((O3, Lp * F), lambda i: (0, 0)),     # folded fc2+fc3 weight
                pl.BlockSpec((O3, 1), lambda i: (0, 0)),          # folded fc2+fc3 bias
            ],
            out_specs=pl.BlockSpec((O3, TB), lambda i: (0, i)),   # lane-dense writeback
        ),
        compiler_params=pltpu.CompilerParams(dimension_semantics=("parallel",)),
    )(x_flat, W_eff, b_eff, W23p, b23)

    return out[:, :B].T                                                    # (B, O3)


def cnn_reference(x, params, *, kernel_size, pool_size):
    """Pure-JAX reference of the (interpreted) PyTorch forward (unfused)."""
    W1, b1, Wc, bc, W2, b2, W3, b3 = params
    B, C, P = x.shape
    H = W1.shape[0]
    F = Wc.shape[0]
    Lc = H - kernel_size + 1
    Lp = Lc // pool_size
    h = jnp.einsum('bcp,hp->bch', x, W1) + b1[None, None, :]               # fc1
    s = jnp.zeros((B, F, Lc), jnp.float32)
    for k in range(kernel_size):                                           # conv1d 'valid'
        s = s + jnp.einsum('bct,fc->bft', h[:, :, k:k + Lc], Wc[:, :, k])
    s = jax.nn.relu(s + bc[None, :, None])
    pooled = s[:, :, :Lp * pool_size].reshape(B, F, Lp, pool_size).max(-1) # maxpool1d
    flat = pooled.reshape(B, F * Lp)                                       # flatten
    o2 = flat @ W2.T + b2                                                  # fc2
    o3 = o2 @ W3.T + b3                                                    # fc3
    return o3


if __name__ == "__main__":
    # Module hyper-parameters (small, consistent with the forward pass).
    B = 300                  # multiple grid steps (TB=128) + ragged tail exercised
    n_variables = 4          # Conv1d in_channels
    previous_steps = 8       # fc1 in_features
    hidden_size = 32         # fc1 out_features == conv input length
    N_filters = 8
    kernel_size = 3
    pool_size = 2
    forecast_steps = 4

    Lc = hidden_size - kernel_size + 1
    Lp = Lc // pool_size
    flat_dim = N_filters * Lp

    key = jax.random.PRNGKey(0)
    k = jax.random.split(key, 9)
    scale = 0.1
    params = (
        scale * jax.random.normal(k[0], (hidden_size, previous_steps), jnp.float32),   # W1
        scale * jax.random.normal(k[1], (hidden_size,), jnp.float32),                  # b1
        scale * jax.random.normal(k[2], (N_filters, n_variables, kernel_size), jnp.float32),  # Wc
        scale * jax.random.normal(k[3], (N_filters,), jnp.float32),                    # bc
        scale * jax.random.normal(k[4], (forecast_steps, flat_dim), jnp.float32),      # W2
        scale * jax.random.normal(k[5], (forecast_steps,), jnp.float32),               # b2
        scale * jax.random.normal(k[6], (forecast_steps, forecast_steps), jnp.float32),# W3
        scale * jax.random.normal(k[7], (forecast_steps,), jnp.float32),               # b3
    )

    x = jax.random.normal(k[8], (B, n_variables, previous_steps), jnp.float32)

    out = cnn_forward(x, params, kernel_size=kernel_size, pool_size=pool_size,
                      batch_tile=128)
    out = jax.block_until_ready(out)

    ref = cnn_reference(x, params, kernel_size=kernel_size, pool_size=pool_size)
    assert out.shape == (B, forecast_steps), out.shape
    assert jnp.allclose(out, ref, rtol=1e-4, atol=1e-5), (out, ref)

    print("KERNEL_OK")
</pallas_src>

<mosaic_0001>
module attributes {stable_mosaic.version = 11 : i64} {
  func.func @_cnn_kernel(%arg0: i32, %arg1: memref<32x128xf32, #tpu.memory_space<vmem>>, %arg2: memref<240x32xf32, #tpu.memory_space<vmem>>, %arg3: memref<240x1xf32, #tpu.memory_space<vmem>>, %arg4: memref<4x120xf32, #tpu.memory_space<vmem>>, %arg5: memref<4x1xf32, #tpu.memory_space<vmem>>, %arg6: memref<4x128xf32, #tpu.memory_space<vmem>>) attributes {dimension_semantics = [#tpu.dimension_semantics<parallel>], iteration_bounds = array<i64: 3>, scalar_prefetch = 0 : i64, scratch_operands = 0 : i64, tpu.core_type = #tpu.core_type<tc>, window_params = [{transform_indices = @transform_0, window_bounds = array<i64: 32, 128>}, {pipeline_mode = #tpu.pipeline_mode<synchronous>, transform_indices = @transform_1, window_bounds = array<i64: 240, 32>}, {pipeline_mode = #tpu.pipeline_mode<synchronous>, transform_indices = @transform_2, window_bounds = array<i64: 240, 1>}, {pipeline_mode = #tpu.pipeline_mode<synchronous>, transform_indices = @transform_3, window_bounds = array<i64: 4, 120>}, {pipeline_mode = #tpu.pipeline_mode<synchronous>, transform_indices = @transform_4, window_bounds = array<i64: 4, 1>}, {transform_indices = @transform_5, window_bounds = array<i64: 4, 128>}]} {
    %c0 = arith.constant 0 : index
    %c0_0 = arith.constant 0 : index
    %0 = vector.load %arg2[%c0, %c0_0] : memref<240x32xf32, #tpu.memory_space<vmem>>, vector<240x32xf32>
    %c0_1 = arith.constant 0 : index
    %c0_2 = arith.constant 0 : index
    %1 = vector.load %arg1[%c0_1, %c0_2] : memref<32x128xf32, #tpu.memory_space<vmem>>, vector<32x128xf32>
    %cst = arith.constant dense<0.000000e+00> : vector<240x128xf32>
    %2 = tpu.matmul %0, %1, %cst {dimension_numbers = #tpu.dot_dimension_numbers<[1], [0], [0], [1], [0, 0, 1, 1], [], []>} : vector<240x32xf32>, vector<32x128xf32>, vector<240x128xf32> -> vector<240x128xf32>
    %c0_3 = arith.constant 0 : index
    %c0_4 = arith.constant 0 : index
    %3 = vector.load %arg3[%c0_3, %c0_4] : memref<240x1xf32, #tpu.memory_space<vmem>>, vector<240x1xf32>
    %4 = vector.broadcast %3 : vector<240x1xf32> to vector<240x128xf32>
    %5 = arith.addf %2, %4 : vector<240x128xf32>
    %cst_5 = arith.constant 0.000000e+00 : f32
    %6 = vector.broadcast %cst_5 : f32 to vector<240x128xf32>
    %7 = arith.maximumf %5, %6 : vector<240x128xf32>
    %8 = vector.shape_cast %7 : vector<240x128xf32> to vector<15x16x128xf32>
    %9 = vector.extract_strided_slice %8 {offsets = [0, 0, 0], sizes = [15, 8, 128], strides = [1, 1, 1]} : vector<15x16x128xf32> to vector<15x8x128xf32>
    %10 = vector.extract_strided_slice %8 {offsets = [0, 8, 0], sizes = [15, 8, 128], strides = [1, 1, 1]} : vector<15x16x128xf32> to vector<15x8x128xf32>
    %11 = arith.maximumf %9, %10 : vector<15x8x128xf32>
    %12 = vector.shape_cast %11 : vector<15x8x128xf32> to vector<120x128xf32>
    %c0_6 = arith.constant 0 : index
    %c0_7 = arith.constant 0 : index
    %13 = vector.load %arg4[%c0_6, %c0_7] : memref<4x120xf32, #tpu.memory_space<vmem>>, vector<4x120xf32>
    %cst_8 = arith.constant dense<0.000000e+00> : vector<4x128xf32>
    %14 = tpu.matmul %13, %12, %cst_8 {dimension_numbers = #tpu.dot_dimension_numbers<[1], [0], [0], [1], [0, 0, 1, 1], [], []>} : vector<4x120xf32>, vector<120x128xf32>, vector<4x128xf32> -> vector<4x128xf32>
    %c0_9 = arith.constant 0 : index
    %c0_10 = arith.constant 0 : index
    %15 = vector.load %arg5[%c0_9, %c0_10] : memref<4x1xf32, #tpu.memory_space<vmem>>, vector<4x1xf32>
    %16 = vector.broadcast %15 : vector<4x1xf32> to vector<4x128xf32>
    %17 = arith.addf %14, %16 : vector<4x128xf32>
    %c0_11 = arith.constant 0 : index
    %c0_12 = arith.constant 0 : index
    %18 = vector.load %arg6[%c0_11, %c0_12] : memref<4x128xf32, #tpu.memory_space<vmem>>, vector<4x128xf32>
    tpu.vector_store %arg6[%c0_11, %c0_12], %17 {strides = array<i32>} : memref<4x128xf32, #tpu.memory_space<vmem>>, vector<4x128xf32>,
    return
  }
  func.func @transform_0(%arg0: i32) -> (i32, i32) {
    %c0_i32 = arith.constant 0 : i32
    %c0_i32_0 = arith.constant 0 : i32
    return %c0_i32, %arg0 : i32, i32
  }
  func.func @transform_1(%arg0: i32) -> (i32, i32) {
    %c0_i32 = arith.constant 0 : i32
    %c0_i32_0 = arith.constant 0 : i32
    %c0_i32_1 = arith.constant 0 : i32
    return %c0_i32, %c0_i32_0 : i32, i32
  }
  func.func @transform_2(%arg0: i32) -> (i32, i32) {
    %c0_i32 = arith.constant 0 : i32
    %c0_i32_0 = arith.constant 0 : i32
    %c0_i32_1 = arith.constant 0 : i32
    return %c0_i32, %c0_i32_0 : i32, i32
  }
  func.func @transform_3(%arg0: i32) -> (i32, i32) {
    %c0_i32 = arith.constant 0 : i32
    %c0_i32_0 = arith.constant 0 : i32
    %c0_i32_1 = arith.constant 0 : i32
    return %c0_i32, %c0_i32_0 : i32, i32
  }
  func.func @transform_4(%arg0: i32) -> (i32, i32) {
    %c0_i32 = arith.constant 0 : i32
    %c0_i32_0 = arith.constant 0 : i32
    %c0_i32_1 = arith.constant 0 : i32
    return %c0_i32, %c0_i32_0 : i32, i32
  }
  func.func @transform_5(%arg0: i32) -> (i32, i32) {
    %c0_i32 = arith.constant 0 : i32
    %c0_i32_0 = arith.constant 0 : i32
    return %c0_i32, %arg0 : i32, i32
  }
}

</mosaic_0001>

<bundles_post_ra>
// kernel: cnn_forward.1
= control target key start
LH: loop header
LB: loop body
LE: loop exit
PB: predicated region body
PF: predicated region fallthrough
CT: control target
= control target key end

     0   :  { %s955_s18 = smov 0   ;;  %s957_s19 = smov 0   ;;  %s1300_s0 = inlined_call_operand.vmem [shape: f32[32,384], index: 0, kind: input, shape index: {}]   ;;  %s1301_s1 = inlined_call_operand.vmem [shape: f32[240,32], index: 1, kind: input, shape index: {}]   ;;  %s1302_s2 = inlined_call_operand.vmem [shape: f32[240,1], index: 2, kind: input, shape index: {}]   ;;  %s1303_s3 = inlined_call_operand.vmem [shape: f32[4,120], index: 3, kind: input, shape index: {}]   ;;  %s1304_s4 = inlined_call_operand.vmem [shape: f32[4,1], index: 4, kind: input, shape index: {}]   ;;  %s1305_s5 = inlined_call_operand.vmem [shape: f32[4,384], index: 5, kind: output, shape index: {}]  }
   0x1   :  { %s959_s20 = smov 0  }
   0x2 LB: > { %s818_s21 = sadd.s32 4294967295, %s922_s20   ;;  %s972_s22 = sadd.s32 1, %s922_s20   ;;  %s922_s20 = sphi %s959_s20, %s1312_s20   ;;  %s918_s19 = sphi %s957_s19, %s1311_s19   ;;  %s914_s18 = sphi %s955_s18, %s1310_s18  }
   0x3   : > { %s19_s23 = ssub.s32 %s922_s20, %s972_s22  ;;  %s22_s24 = sadd.s32 1, %s918_s19 }
   0x4   : > { %p20_p0 = scmp.eq.s32.totalorder %s19_s23, 0  ;;  %p29_p1 = scmp.ne.s32.totalorder %s918_s19, %s914_s18 }
   0x5   : > { %p30_p2 = scmp.eq.s32.totalorder %s922_s20, 0  ;;  %p821_p4 = scmp.ge.s32.totalorder %s922_s20, 3 }
   0x6   : > { %s981_s25 = scalar_select %p20_p0, %s918_s19, %s22_s24  }
   0x7   : > { %p31_p3 = por %p30_p2, %p29_p1  ;;  %177 = sbr.rel (%p821_p4) target bundleno = 20 (0x14), region = 32 }
   0xc   : > { %180 = sbr.rel (!%p31_p3) target bundleno = 20 (0x14), region = 36  ;;  %s182_s26 = sand.u32 (%p31_p3), 1, %s918_s19  }
   0xd   : > { %s823_s27 = sshll.u32 (%p31_p3), %s922_s20, 3  ;;  %s822_s28 = sshll.u32 (%p31_p3), %s182_s26, 5 }
   0xe   : > { %s186_s6 = scalar_lea.vmem (%p31_p3), %s1300_s0, %s823_s27  ;;  %s184_s7 = scalar_lea.vmem (%p31_p3), [#allocation2], %s822_s28 }
   0xf   : > { %v221_v0 = vld [vmem:[%s186_s6] sm:$0xff] (%p31_p3)  ;;  %v223_v1 = vld [vmem:[%s186_s6 + $0x18] sm:$0xff] (%p31_p3)  ;;  %v225_v2 = vld [vmem:[%s186_s6 + $0x30] sm:$0xff] (%p31_p3) }
  0x10   : > { %222 = vst [vmem:[%s184_s7] sm:$0xff] (%p31_p3), %v221_v0  ;;  %v227_v3 = vld [vmem:[%s186_s6 + $0x48] sm:$0xff] (%p31_p3) }
  0x11   : > { %224 = vst [vmem:[%s184_s7 + $0x8] sm:$0xff] %v223_v1 }
  0x12   : > { %226 = vst [vmem:[%s184_s7 + $0x10] sm:$0xff] %v225_v2 }
  0x13   : > { %228 = vst [vmem:[%s184_s7 + $0x18] sm:$0xff] %v227_v3 }
  0x14 PF: > { %p824_p5 = scmp.ge.s32.totalorder %s922_s20, 1  ;;  %p233_p6 = scmp.lt.s32.totalorder %s922_s20, 4 }
  0x16   : > { %p234_p7 = pnand %p824_p5, %p233_p6 }
  0x18   : > { %237 = sbr.rel (%p234_p7) target bundleno = 396 (0x18c), region = 74 }
  0x1d   : > { %v332_v4 = vld [vmem:[%s1302_s2 + $0xe0] sm:$0xff]  ;;  %v330_v5 = vld [vmem:[%s1302_s2 + $0xd0] sm:$0xff]  ;;  %s240_s14 = sand.u32 1, %s914_s18   ;;  %v924_v7 = vmov 0   ;;  %v331_v11 = vld [vmem:[%s1302_s2 + $0xd8] sm:$0xff]  ;;  %vm484_vm0 = vcmask 261120  }
  0x1e   : > { %v328_v6 = vld [vmem:[%s1302_s2 + $0xc0] sm:$0xff]  ;;  %899 = vset.pattern.permute.xlu2 %v924_v7  ;;  %898 = vset.pattern.permute.xlu1 %v924_v7  ;;  %s825_s15 = sshll.u32 %s240_s14, 5  ;;  %v333_v13 = vld [vmem:[%s1302_s2 + $0xe8] sm:$0xff]  ;;  %v292_v18 = vld [vmem:[%s1301_s1 + $0xb0] sm:$0xff]  ;;  %vm734_vm1 = vcmask 982016   ;;  %p266_p8 = scmp.lt.s32.totalorder %s818_s21, 2 }
  0x1f   : > { %897 = vset.pattern.permute.xlu0 %v924_v7  ;;  %466 = vperm.xlu1 %898, %v330_v5   ;;  %s242_s16 = scalar_lea.vmem [#allocation2], %s825_s15  ;;  %v329_v14 = vld [vmem:[%s1302_s2 + $0xc8] sm:$0xff]  ;;  %v270_v15 = vld [vmem:[%s1301_s1] sm:$0xff]  ;;  %v327_v19 = vld [vmem:[%s1302_s2 + $0xb8] sm:$0xff] }
  0x20   : > { %476 = vperm.xlu0 %897, %v332_v4   ;;  %456 = vperm.xlu2 %899, %v328_v6   ;;  %v303_v8 = vld [vmem:[%s242_s16 + $0x18] sm:$0xff]  ;;  %v302_v9 = vld [vmem:[%s242_s16 + $0x10] sm:$0xff]  ;;  %v301_v10 = vld [vmem:[%s242_s16 + $0x8] sm:$0xff]  ;;  %s1314_s21 = smov (!%p266_p8, %s818_s21), 2 }
  0x21   : > { %587 = vmatpush.msra.mxu0 %v303_v8  ;;  %860 = vmatpush.msra.mxu1 %v303_v8  ;;  %v300_v12 = vld [vmem:[%s242_s16] sm:$0xff]  ;;  %v279_v16 = vld [vmem:[%s1301_s1 + $0x48] sm:$0xff]  ;;  %v326_v20 = vld [vmem:[%s1302_s2 + $0xb0] sm:$0xff]  ;;  %s826_s15 = sshll.u32 %s1314_s21, 2 }
  0x22   : > { %861 = vmatpush.msra.mxu2 %v303_v8  ;;  %862 = vmatpush.msra.mxu3 %v303_v8  ;;  %v283_v17 = vld [vmem:[%s1301_s1 + $0x68] sm:$0xff]  ;;  %v324_v21 = vld [vmem:[%s1302_s2 + $0xa0] sm:$0xff]  ;;  %v280_v23 = vld [vmem:[%s1301_s1 + $0x50] sm:$0xff]  ;;  %s269_s18 = scalar_lea.vmem %s1305_s5, %s826_s15 }
  0x23   : > { %588 = vmatpush.msra.mxu0 %v302_v9  ;;  %863 = vmatpush.msra.mxu1 %v302_v9  ;;  %v271_v22 = vld [vmem:[%s1301_s1 + $0x8] sm:$0xff]  ;;  %v284_v24 = vld [vmem:[%s1301_s1 + $0x70] sm:$0xff]  ;;  %v293_v25 = vld [vmem:[%s1301_s1 + $0xb8] sm:$0xff] }
  0x24   : > { %864 = vmatpush.msra.mxu2 %v302_v9  ;;  %865 = vmatpush.msra.mxu3 %v302_v9  ;;  %v322_v26 = vld [vmem:[%s1302_s2 + $0x90] sm:$0xff]  ;;  %v325_v27 = vld [vmem:[%s1302_s2 + $0xa8] sm:$0xff]  ;;  %v323_v28 = vld [vmem:[%s1302_s2 + $0x98] sm:$0xff] }
  0x25   : > { %589 = vmatpush.msra.mxu0 %v301_v10  ;;  %866 = vmatpush.msra.mxu1 %v301_v10  ;;  %v272_v29 = vld [vmem:[%s1301_s1 + $0x10] sm:$0xff]  ;;  %v281_v30 = vld [vmem:[%s1301_s1 + $0x58] sm:$0xff]  ;;  %v294_v32 = vld [vmem:[%s1301_s1 + $0xc0] sm:$0xff] }
  0x26   : > { %867 = vmatpush.msra.mxu2 %v301_v10  ;;  %868 = vmatpush.msra.mxu3 %v301_v10  ;;  %v285_v31 = vld [vmem:[%s1301_s1 + $0x78] sm:$0xff]  ;;  %v321_v33 = vld [vmem:[%s1302_s2 + $0x88] sm:$0xff]  ;;  %v320_v34 = vld [vmem:[%s1302_s2 + $0x80] sm:$0xff] }
  0x27   : > { %471 = vperm.xlu1 %898, %v331_v11   ;;  %590 = vmatpush.msra.mxu0 %v300_v12  ;;  %v318_v35 = vld [vmem:[%s1302_s2 + $0x70] sm:$0xff]  ;;  %v273_v36 = vld [vmem:[%s1301_s1 + $0x18] sm:$0xff]  ;;  %v282_v37 = vld [vmem:[%s1301_s1 + $0x60] sm:$0xff] }
  0x28   : > { %481 = vperm.xlu0 %897, %v333_v13   ;;  %461 = vperm.xlu2 %899, %v329_v14   ;;  %v286_v38 = vld [vmem:[%s1301_s1 + $0x80] sm:$0xff]  ;;  %v295_v39 = vld [vmem:[%s1301_s1 + $0xc8] sm:$0xff]  ;;  %v319_v41 = vld [vmem:[%s1302_s2 + $0x78] sm:$0xff] }
  0x29   : > { %869 = vmatpush.msra.mxu1 %v300_v12  ;;  %870 = vmatpush.msra.mxu2 %v300_v12  ;;  %v316_v40 = vld [vmem:[%s1302_s2 + $0x60] sm:$0xff]  ;;  %v317_v42 = vld [vmem:[%s1302_s2 + $0x68] sm:$0xff]  ;;  %v296_v45 = vld [vmem:[%s1301_s1 + $0xd0] sm:$0xff] }
  0x2a   : > { %871 = vmatpush.msra.mxu3 %v300_v12  ;;  %827 = vmatmul.msk.f32.vlgmr.msra.gmra.mxu0 %vm484_vm0, %v270_v15  ;;  %v274_v43 = vld [vmem:[%s1301_s1 + $0x20] sm:$0xff]  ;;  %v287_v44 = vld [vmem:[%s1301_s1 + $0x88] sm:$0xff]  ;;  %v315_v46 = vld [vmem:[%s1302_s2 + $0x58] sm:$0xff] }
  0x2b   : > { %836 = vmatmul.msk.f32.vlgmr.msra.gmra.mxu1 %vm484_vm0, %v279_v16  ;;  %840 = vmatmul.msk.f32.vlgmr.msra.gmra.mxu2 %vm484_vm0, %v283_v17  ;;  %v314_v47 = vld [vmem:[%s1302_s2 + $0x50] sm:$0xff]  ;;  %v312_v48 = vld [vmem:[%s1302_s2 + $0x40] sm:$0xff]  ;;  %v275_v49 = vld [vmem:[%s1301_s1 + $0x28] sm:$0xff] }
  0x2c   : > { %849 = vmatmul.msk.f32.vlgmr.msra.gmra.mxu3 %vm484_vm0, %v292_v18  ;;  %v288_v50 = vld [vmem:[%s1301_s1 + $0x90] sm:$0xff]  ;;  %v297_v51 = vld [vmem:[%s1301_s1 + $0xd8] sm:$0xff]  ;;  %v313_v53 = vld [vmem:[%s1302_s2 + $0x48] sm:$0xff] }
  0x2d   : > { %v310_v52 = vld [vmem:[%s1302_s2 + $0x30] sm:$0xff]  ;;  %v311_v54 = vld [vmem:[%s1302_s2 + $0x38] sm:$0xff]  ;;  %v298_v57 = vld [vmem:[%s1301_s1 + $0xe0] sm:$0xff] }
  0x2e   : > { %v276_v55 = vld [vmem:[%s1301_s1 + $0x30] sm:$0xff]  ;;  %v289_v56 = vld [vmem:[%s1301_s1 + $0x98] sm:$0xff]  ;;  %v309_v58 = vld [vmem:[%s1302_s2 + $0x28] sm:$0xff] }
  0x2f   : > { %451 = vperm.xlu1 %898, %v327_v19   ;;  %v308_v59 = vld [vmem:[%s1302_s2 + $0x20] sm:$0xff]  ;;  %v306_v60 = vld [vmem:[%s1302_s2 + $0x10] sm:$0xff]  ;;  %v277_v61 = vld [vmem:[%s1301_s1 + $0x38] sm:$0xff] }
  0x30   : > { %446 = vperm.xlu0 %897, %v326_v20   ;;  %436 = vperm.xlu2 %899, %v324_v21   ;;  %v290_v62 = vld [vmem:[%s1301_s1 + $0xa0] sm:$0xff]  ;;  %v299_v63 = vld [vmem:[%s1301_s1 + $0xe8] sm:$0xff]  ;;  %v307_v1 = vld [vmem:[%s1302_s2 + $0x18] sm:$0xff] }
  0x31   : > { %v304_v0 = vld [vmem:[%s1302_s2] sm:$0xff]  ;;  %v305_v2 = vld [vmem:[%s1302_s2 + $0x8] sm:$0xff] }
  0x32   : > { %828 = vmatmul.msk.f32.gmra.mxu0 %vm484_vm0, %v271_v22  ;;  %v278_v3 = vld [vmem:[%s1301_s1 + $0x40] sm:$0xff]  ;;  %v291_v4 = vld [vmem:[%s1301_s1 + $0xa8] sm:$0xff] }
  0x33   : > { %837 = vmatmul.msk.f32.gmra.mxu1 %vm484_vm0, %v280_v23  ;;  %841 = vmatmul.msk.f32.gmra.mxu2 %vm484_vm0, %v284_v24  ;;  %v728_v5 = vld [vmem:[%s1304_s4] sm:$0xf] }
  0x34   : > { %850 = vmatmul.msk.f32.gmra.mxu3 %vm484_vm0, %v293_v25 }
  0x37   : > { %426 = vperm.xlu1 %898, %v322_v26  }
  0x38   : > { %441 = vperm.xlu0 %897, %v325_v27   ;;  %431 = vperm.xlu2 %899, %v323_v28  }
  0x3a   : > { %829 = vmatmul.msk.f32.gmra.mxu0 %vm484_vm0, %v272_v29 }
  0x3b   : > { %838 = vmatmul.msk.f32.gmra.mxu1 %vm484_vm0, %v281_v30  ;;  %842 = vmatmul.msk.f32.gmra.mxu2 %vm484_vm0, %v285_v31 }
  0x3c   : > { %851 = vmatmul.msk.f32.gmra.mxu3 %vm484_vm0, %v294_v32 }
  0x3f   : > { %421 = vperm.xlu1 %898, %v321_v33  }
  0x40   : > { %416 = vperm.xlu0 %897, %v320_v34   ;;  %406 = vperm.xlu2 %899, %v318_v35  }
  0x42   : > { %830 = vmatmul.msk.f32.gmra.mxu0 %vm484_vm0, %v273_v36 }
  0x43   : > { %839 = vmatmul.msk.f32.gmra.mxu1 %vm484_vm0, %v282_v37  ;;  %843 = vmatmul.msk.f32.gmra.mxu2 %vm484_vm0, %v286_v38 }
  0x44   : > { %852 = vmatmul.msk.f32.gmra.mxu3 %vm484_vm0, %v295_v39 }
  0x47   : > { %396 = vperm.xlu1 %898, %v316_v40  }
  0x48   : > { %411 = vperm.xlu0 %897, %v319_v41   ;;  %401 = vperm.xlu2 %899, %v317_v42  }
  0x4a   : > { %831 = vmatmul.msk.f32.gmra.mxu0 %vm484_vm0, %v274_v43 }
  0x4b   : > { %844 = vmatmul.msk.f32.gmra.mxu2 %vm484_vm0, %v287_v44 }
  0x4c   : > { %853 = vmatmul.msk.f32.gmra.mxu3 %vm484_vm0, %v296_v45 }
  0x4f   : > { %391 = vperm.xlu1 %898, %v315_v46  }
  0x50   : > { %386 = vperm.xlu0 %897, %v314_v47   ;;  %376 = vperm.xlu2 %899, %v312_v48  }
  0x52   : > { %832 = vmatmul.msk.f32.gmra.mxu0 %vm484_vm0, %v275_v49 }
  0x53   : > { %845 = vmatmul.msk.f32.gmra.mxu2 %vm484_vm0, %v288_v50 }
  0x54   : > { %854 = vmatmul.msk.f32.gmra.mxu3 %vm484_vm0, %v297_v51 }
  0x57   : > { %366 = vperm.xlu1 %898, %v310_v52  }
  0x58   : > { %381 = vperm.xlu0 %897, %v313_v53   ;;  %371 = vperm.xlu2 %899, %v311_v54  }
  0x5a   : > { %833 = vmatmul.msk.f32.gmra.mxu0 %vm484_vm0, %v276_v55 }
  0x5b   : > { %846 = vmatmul.msk.f32.gmra.mxu2 %vm484_vm0, %v289_v56 }
  0x5c   : > { %855 = vmatmul.msk.f32.gmra.mxu3 %vm484_vm0, %v298_v57 }
  0x5f   : > { %361 = vperm.xlu1 %898, %v309_v58  }
  0x60   : > { %356 = vperm.xlu0 %897, %v308_v59   ;;  %346 = vperm.xlu2 %899, %v306_v60  }
  0x62   : > { %834 = vmatmul.msk.f32.gmra.mxu0 %vm484_vm0, %v277_v61 }
  0x63   : > { %847 = vmatmul.msk.f32.gmra.mxu2 %vm484_vm0, %v290_v62 }
  0x64   : > { %856 = vmatmul.msk.f32.gmra.mxu3 %vm484_vm0, %v299_v63 }
  0x67   : > { %336 = vperm.xlu1 %898, %v304_v0  }
  0x68   : > { %351 = vperm.xlu0 %897, %v307_v1   ;;  %341 = vperm.xlu2 %899, %v305_v2  }
  0x6a   : > { %835 = vmatmul.msk.f32.gmra.mxu0 %vm484_vm0, %v278_v3 }
  0x6b   : > { %848 = vmatmul.msk.f32.gmra.mxu2 %vm484_vm0, %v291_v4 }
  0x70   : > { %731 = vperm.xlu0 %897, %v728_v5  }
  0x7a   : > { %v1205_v6 = vpop.permute.xlu2 %456 }
  0x82   : > { %v462_v7 = vpop.permute.xlu2 %461 }
  0x8a   : > { %v1207_v8 = vpop.permute.xlu2 %436 }
  0x91   : > { %v467_v9 = vpop.permute.xlu1 %466 }
  0x92   : > { %v1209_v10 = vpop.permute.xlu2 %431  ;;  %v477_v12 = vpop.permute.xlu0 %476 }
  0x99   : > { %v472_v11 = vpop.permute.xlu1 %471 }
  0x9a   : > { %v1211_v14 = vpop.permute.xlu2 %406  ;;  %v482_v17 = vpop.permute.xlu0 %481 }
  0xa1   : > { %v452_v13 = vpop.permute.xlu1 %451 }
  0xa2   : > { %v1215_v18 = vpop.permute.xlu2 %401  ;;  %v447_v23 = vpop.permute.xlu0 %446 }
  0xa7   : > { %v592_v15 = vpop.f32.mrf.mxu0 }
  0xa8   : > { %v1247_v44 = vpop.f32.mrf.mxu1 }
  0xa9   : > { %v1213_v16 = vpop.permute.xlu1 %426 }
  0xaa   : > { %v1223_v25 = vpop.permute.xlu2 %376  ;;  %v442_v30 = vpop.permute.xlu0 %441 }
  0xae   : > { %v1217_v19 = vpop.f32.mrf.mxu2 }
  0xaf   : > { %v658_v20 = vpop.f32.mrf.mxu3  ;;  %v595_v21 = vpop.f32.mrf.mxu0 }
  0xb0   : > { %v622_v53 = vpop.f32.mrf.mxu1 }
  0xb1   : > { %v1219_v22 = vpop.permute.xlu1 %421 }
  0xb2   : > { %v1231_v32 = vpop.permute.xlu2 %371  ;;  %v417_v37 = vpop.permute.xlu0 %416 }
  0xb6   : > { %v1221_v24 = vpop.f32.mrf.mxu2 }
  0xb7   : > { %v661_v26 = vpop.f32.mrf.mxu3  ;;  %v1225_v27 = vpop.f32.mrf.mxu0 }
  0xb8   : > { %1306 = vst [vmem:[#allocation3_spill] sm:$0xff] %v1225_v27  ;;  %v625_v61 = vpop.f32.mrf.mxu1 }
  0xb9   : > { %v1227_v28 = vpop.permute.xlu1 %396 }
  0xba   : > { %v1241_v39 = vpop.permute.xlu2 %346  ;;  %v412_v45 = vpop.permute.xlu0 %411 }
  0xbe   : > { %v1229_v29 = vpop.f32.mrf.mxu2 }
  0xbf   : > { %v664_v31 = vpop.f32.mrf.mxu3  ;;  %v1235_v34 = vpop.f32.mrf.mxu0 }
  0xc1   : > { %v1233_v33 = vpop.permute.xlu1 %391 }
  0xc2   : > { %v342_v46 = vpop.permute.xlu2 %341  ;;  %v387_v56 = vpop.permute.xlu0 %386 }
  0xc3   : > { %v596_v50 = vadd.f32 %v595_v21, %v342_v46  ;;  %v665_v21 = vadd.f32 %v664_v31, %v1205_v6  ;;  %v628_v6 = vpop.f32.mrf.mxu1 }
  0xc5   : > { %v683_v54 = vmax.f32 %v596_v50, 0.0 }
  0xc6   : > { %v1237_v35 = vpop.f32.mrf.mxu2 }
  0xc7   : > { %v667_v36 = vpop.f32.mrf.mxu3  ;;  %v1243_v40 = vpop.f32.mrf.mxu0 }
  0xc8   : > { %v668_v3 = vadd.f32 %v667_v36, %v462_v7 }
  0xc9   : > { %v1239_v38 = vpop.permute.xlu1 %366 }
  0xca   : > { %v382_v1 = vpop.permute.xlu0 %381 }
  0xce   : > { %v643_v41 = vpop.f32.mrf.mxu2 }
  0xcf   : > { %v670_v42 = vpop.f32.mrf.mxu3  ;;  %v1249_v48 = vpop.f32.mrf.mxu0 }
  0xd0   : > { %v671_v4 = vadd.f32 %v670_v42, %v467_v9 }
  0xd1   : > { %v1245_v43 = vpop.permute.xlu1 %361 }
  0xd2   : > { %v357_v36 = vpop.permute.xlu0 %356 }
  0xd6   : > { %v646_v47 = vpop.f32.mrf.mxu2 }
  0xd7   : > { %v673_v49 = vpop.f32.mrf.mxu3  ;;  %v1253_v60 = vpop.f32.mrf.mxu0  ;;  %v647_v31 = vadd.f32 %v646_v47, %v1213_v16 }
  0xd8   : > { %v674_v62 = vadd.f32 %v673_v49, %v472_v11  ;;  %v706_v49 = vmax.f32 %v665_v21, 0.0 }
  0xd9   : > { %v337_v51 = vpop.permute.xlu1 %336  ;;  %v700_v16 = vmax.f32 %v647_v31, 0.0 }
  0xda   : > { %v593_v52 = vadd.f32 %v592_v15, %v337_v51  ;;  %v662_v15 = vadd.f32 %v661_v26, %v452_v13  ;;  %v709_v46 = vmax.f32 %v674_v62, 0.0  ;;  %v644_v26 = vadd.f32 %v643_v41, %v1219_v22 }
  0xdb   : > { %v641_v62 = vadd.f32 %v1237_v35, %v417_v37  ;;  %v623_v35 = vadd.f32 %v622_v53, %v387_v56  ;;  %v608_v56 = vadd.f32 %v1249_v48, %v1245_v43 }
  0xdc   : > { %v682_v55 = vmax.f32 %v593_v52, 0.0  ;;  %v699_v41 = vmax.f32 %v644_v26, 0.0 }
  0xdd   : > { %v698_v37 = vmax.f32 %v641_v62, 0.0 }
  0xde   : > { %v649_v57 = vpop.f32.mrf.mxu2  ;;  %v1251_v58 = vmax.f32 %v682_v55, %v683_v54  ;;  %v659_v54 = vadd.f32 %v658_v20, %v447_v23  ;;  %v707_v55 = vmax.f32 %v668_v3, 0.0  ;;  %v638_v23 = vadd.f32 %v1229_v29, %v412_v45 }
  0xdf   : > { %v676_v59 = vpop.f32.mrf.mxu3  ;;  %v613_v52 = vpop.f32.mrf.mxu0  ;;  %v632_v29 = vadd.f32 %v1217_v19, %v1215_v18  ;;  %v620_v18 = vadd.f32 %v1247_v44, %v382_v1 }
  0xe0   : > { %1307 = vst [vmem:[#allocation4_spill] sm:$0xff] %v1251_v58  ;;  %v677_v63 = vadd.f32 %v676_v59, %v477_v12  ;;  %v708_v58 = vmax.f32 %v671_v4, 0.0  ;;  %v705_v12 = vmax.f32 %v662_v15, 0.0  ;;  %v650_v59 = vadd.f32 %v649_v57, %v1209_v10 }
  0xe1   : > { %v724_v20 = vmax.f32 %v706_v49, %v707_v55  ;;  %v629_v57 = vadd.f32 %v628_v6, %v1227_v28  ;;  %v697_v45 = vmax.f32 %v638_v23, 0.0  ;;  %v695_v28 = vmax.f32 %v632_v29, 0.0 }
  0xe2   : > { %v710_v50 = vmax.f32 %v677_v63, 0.0  ;;  %v725_v9 = vmax.f32 %v708_v58, %v709_v46  ;;  %v701_v10 = vmax.f32 %v650_v59, 0.0  ;;  %v626_v58 = vadd.f32 %v625_v61, %v1233_v33  ;;  %v352_v33 = vpop.permute.xlu0 %351 }
  0xe3   : > { %v614_v19 = vadd.f32 %v613_v52, %v1231_v32  ;;  %v605_v61 = vadd.f32 %v1243_v40, %v357_v36  ;;  %v691_v21 = vmax.f32 %v620_v18, 0.0  ;;  %v602_v46 = vadd.f32 %v1235_v34, %v352_v33  ;;  %v1308_v32 = vld [vmem:[#allocation3_spill] sm:$0xff] }
  0xe4   : > { %v721_v63 = vmax.f32 %v700_v16, %v701_v10  ;;  %v693_v4 = vmax.f32 %v626_v58, 0.0  ;;  %v599_v1 = vadd.f32 %v1308_v32, %v1241_v39  ;;  %v727_v39 = vld [vmem:[%s1303_s3] sm:$0xf] }
  0xe5   : > { %v686_v52 = vmax.f32 %v605_v61, 0.0  ;;  %v685_v43 = vmax.f32 %v602_v46, 0.0 }
  0xe6   : > { %v652_v0 = vpop.f32.mrf.mxu2  ;;  %v684_v48 = vmax.f32 %v599_v1, 0.0 }
  0xe7   : > { %v679_v2 = vpop.f32.mrf.mxu3  ;;  %v653_v11 = vadd.f32 %v652_v0, %v1207_v8  ;;  %v616_v47 = vpop.f32.mrf.mxu0  ;;  %v1309_v55 = vld [vmem:[#allocation4_spill] sm:$0xff] }
  0xe8   : > { %v680_v5 = vadd.f32 %v679_v2, %v482_v17  ;;  %v704_v17 = vmax.f32 %v659_v54, 0.0  ;;  %v694_v2 = vmax.f32 %v629_v57, 0.0  ;;  %v713_v34 = vmax.f32 %v684_v48, %v685_v43 }
  0xe9   : > { %v702_v8 = vmax.f32 %v653_v11, 0.0 }
  0xea   : > { %v711_v51 = vmax.f32 %v680_v5, 0.0  ;;  %v692_v5 = vmax.f32 %v623_v35, 0.0  ;;  %v718_v53 = vmax.f32 %v694_v2, %v695_v28  ;;  %v732_v11 = vpop.permute.xlu0 %731 }
  0xec   : > { %v726_v27 = vmax.f32 %v710_v50, %v711_v51  ;;  %v689_v50 = vmax.f32 %v614_v19, 0.0  ;;  %v717_v44 = vmax.f32 %v692_v5, %v693_v4  ;;  %v687_v51 = vmax.f32 %v608_v56, 0.0 }
  0xee   : > { %739 = vmatpush.msrb.mxu1 %v726_v27  ;;  %v655_v7 = vpop.f32.mrf.mxu2  ;;  %v723_v27 = vmax.f32 %v704_v17, %v705_v12 }
  0xef   : > { %v656_v13 = vadd.f32 %v655_v7, %v442_v30  ;;  %v635_v30 = vadd.f32 %v1221_v24, %v1211_v14  ;;  %v617_v14 = vadd.f32 %v616_v47, %v1223_v25  ;;  %v720_v24 = vmax.f32 %v698_v37, %v699_v41 }
  0xf0   : > { %740 = vmatpush.msrb.mxu1 %v725_v9  ;;  %v611_v25 = vadd.f32 %v1253_v60, %v1239_v38  ;;  %v714_v60 = vmax.f32 %v686_v52, %v687_v51 }
  0xf1   : > { %v703_v42 = vmax.f32 %v656_v13, 0.0  ;;  %v696_v0 = vmax.f32 %v635_v30, 0.0  ;;  %v690_v15 = vmax.f32 %v617_v14, 0.0 }
  0xf2   : > { %741 = vmatpush.msrb.mxu1 %v724_v20  ;;  %v688_v54 = vmax.f32 %v611_v25, 0.0 }
  0xf3   : > { %v722_v22 = vmax.f32 %v702_v8, %v703_v42  ;;  %v719_v3 = vmax.f32 %v696_v0, %v697_v45  ;;  %v716_v40 = vmax.f32 %v690_v15, %v691_v21 }
  0xf4   : > { %742 = vmatpush.msrb.mxu1 %v723_v27  ;;  %v715_v38 = vmax.f32 %v688_v54, %v689_v50 }
  0xf6   : > { %743 = vmatpush.msrb.mxu1 %v722_v22 }
  0xf8   : > { %744 = vmatpush.msrb.mxu1 %v721_v63 }
  0xfa   : > { %745 = vmatpush.msrb.mxu1 %v720_v24 }
  0xfc   : > { %746 = vmatpush.msrb.mxu1 %v719_v3 }
  0xfe   : > { %747 = vmatpush.msrb.mxu1 %v718_v53 }
 0x100   : > { %748 = vmatpush.msrb.mxu1 %v717_v44 }
 0x102   : > { %749 = vmatpush.msrb.mxu1 %v716_v40 }
 0x104   : > { %750 = vmatpush.msrb.mxu1 %v715_v38 }
 0x106   : > { %751 = vmatpush.msrb.mxu1 %v714_v60 }
 0x108   : > { %752 = vmatpush.msrb.mxu1 %v713_v34 }
 0x10a   : > { %753 = vmatpush.msrb.mxu1 %v1309_v55 }
 0x10b   : > { %857 = vmatmul.msk.f32.vlgmr.msrb.gmra.mxu1 %vm734_vm1, %v727_v39 }
 0x188   : > { %v755_v12 = vpop.f32.mrf.mxu1 }
 0x189   : > { %v756_v49 = vadd.f32 %v755_v12, %v732_v11 }
 0x18b   : > { %758 = vst [vmem:[%s269_s18] sm:$0xf] %v756_v49 }
 0x18c PF: > { %p12_p9 = scmp.ge.s32.totalorder %s972_s22, 5   ;;  %s1310_s18 = smov %s918_s19 }
 0x18d   : > { %s1311_s19 = smov %s981_s25  ;;  %s1312_s20 = smov %s972_s22 }
 0x18e   :  { %14 = sbr.rel (!%p12_p9) target bundleno = 2 (0x2), region = 113 }

</bundles_post_ra>
